<compile_context>
chip_gen: v7x
topology: tpu7x:2x2x1
jax: 0.10.0
libtpu: 0.0.40
codegen_flags: <defaults>
</compile_context>

<pallas_src>
import numpy as np
import jax
import jax.numpy as jnp
from jax import lax
from jax.experimental import pallas as pl
from jax.experimental.pallas import tpu as pltpu


# Tap order t = (dh+1)*3 + (dw+1); must match mask rows and weight reshape.
_OFFSETS = [(dh, dw) for dh in (-1, 0, 1) for dw in (-1, 0, 1)]


def _make_broadcast_masks(N, Cp, H, W):
    """(9*Cp, N*H*W) f32. Row t*Cp + ci, lane n*P + q is 1 iff tap t of pixel q
    lies inside the image (emulates zero padding=1 and kills roll wraparound,
    including wraparound across concatenated images along the lane axis)."""
    P = H * W
    h = np.arange(P) // W
    w = np.arange(P) % W
    rows = []
    for dh, dw in _OFFSETS:
        m = ((h + dh >= 0) & (h + dh < H) & (w + dw >= 0) & (w + dw < W))
        rows.append(m.astype(np.float32))
    masks = np.stack(rows, axis=0)            # (9, P)
    masks = np.tile(masks, (1, N))            # (9, N*P)   per-image along lanes
    masks = np.repeat(masks, Cp, axis=0)      # (9*Cp, N*P) row = t*Cp + ci
    return jnp.asarray(masks)


def _make_basic_block_kernel(H, W, NP):
    def kernel(maskb_ref, x_ref, w1_ref, b1_ref, w2_ref, b2_ref, o_ref):
        # maskb_ref: (9*Cp, NP)  pre-broadcast boundary masks
        # x_ref    : (Cp, NP)    channels on sublanes, all pixels on lanes
        # w*_ref   : (Cp, 9*Cp)  im2col-reshaped conv weights
        # b*_ref   : (Cp, 1)     biases
        # o_ref    : (Cp, NP)
        x = x_ref[...]
        maskb = maskb_ref[...]
        w1 = w1_ref[...]
        w2 = w2_ref[...]
        b1 = b1_ref[...]
        b2 = b2_ref[...]

        def im2col(a):
            # (Cp, NP) -> (9*Cp, NP); row t*Cp + ci = channel ci shifted by tap
            # t via XLU roll. One full-tile multiply applies the zero-padding
            # mask for all taps at once (center-tap rows are all ones).
            taps = []
            for dh, dw in _OFFSETS:
                s = dh * W + dw
                if s == 0:
                    taps.append(a)
                else:
                    taps.append(pltpu.roll(a, shift=(-s) % NP, axis=1))
            return jnp.concatenate(taps, axis=0) * maskb

        # conv1 (3x3, stride 1, pad 1) + ReLU — one MXU matmul, K = 9*Cp.
        y1 = jnp.dot(w1, im2col(x), preferred_element_type=jnp.float32)
        y1 = jnp.maximum(y1 + b1, 0.0)

        # conv2 (3x3, stride 1, pad 1).
        y2 = jnp.dot(w2, im2col(y1), preferred_element_type=jnp.float32)
        y2 = y2 + b2

        # residual add + ReLU (identity shortcut: C_in == C_out, stride 1).
        o_ref[...] = jnp.maximum(x + y2, 0.0).astype(o_ref.dtype)

    return kernel


def basic_block_forward(x_nchw, w1_oihw, b1, w2_oihw, b2):
    """PyTorch-semantics forward of basic_block. Input/output are NCHW."""
    N, C, H, W = x_nchw.shape
    P = H * W
    NP = N * P
    Cp = max(8, ((C + 7) // 8) * 8)   # pad channels to a full sublane group

    # NCHW -> (Cp, N*P): tiny wrapper-side transpose/pad, lane-dense inside.
    x2d = jnp.transpose(x_nchw.reshape(N, C, P), (1, 0, 2)).reshape(C, NP)
    x2d = jnp.pad(x2d.astype(jnp.float32), ((0, Cp - C), (0, 0)))

    def prep_w(w):
        # OIHW -> pad O,I -> (O, KH, KW, I) -> (Cp, 9*Cp); column = t*Cp + ci.
        wp = jnp.pad(w.astype(jnp.float32),
                     ((0, Cp - C), (0, Cp - C), (0, 0), (0, 0)))
        return jnp.transpose(wp, (0, 2, 3, 1)).reshape(Cp, 9 * Cp)

    def prep_b(b):
        return jnp.pad(b.astype(jnp.float32), (0, Cp - C)).reshape(Cp, 1)

    w1_2d, w2_2d = prep_w(w1_oihw), prep_w(w2_oihw)
    b1_c, b2_c = prep_b(b1), prep_b(b2)
    maskb = _make_broadcast_masks(N, Cp, H, W)

    vmem = pl.BlockSpec(memory_space=pltpu.MemorySpace.VMEM)
    out2d = pl.pallas_call(
        _make_basic_block_kernel(H, W, NP),
        out_shape=jax.ShapeDtypeStruct((Cp, NP), jnp.float32),
        in_specs=[vmem, vmem, vmem, vmem, vmem, vmem],
        out_specs=vmem,
    )(maskb, x2d, w1_2d, b1_c, w2_2d, b2_c)

    out = out2d[:C].reshape(C, N, P)
    return jnp.transpose(out, (1, 0, 2)).reshape(N, C, H, W).astype(x_nchw.dtype)


def _reference(x, w1, b1, w2, b2):
    """Pure-JAX reference (same semantics as the PyTorch module)."""
    dn = ("NCHW", "OIHW", "NCHW")
    y = lax.conv_general_dilated(x, w1, (1, 1), ((1, 1), (1, 1)),
                                 dimension_numbers=dn)
    y = jnp.maximum(y + b1.reshape(1, -1, 1, 1), 0.0)
    y = lax.conv_general_dilated(y, w2, (1, 1), ((1, 1), (1, 1)),
                                 dimension_numbers=dn)
    y = y + b2.reshape(1, -1, 1, 1)
    return jnp.maximum(x + y, 0.0)


if __name__ == "__main__":
    # Shapes consistent with basic_block(in_channels=4) on a 2x4x16x16 input.
    N, C, H, W = 2, 4, 16, 16
    key = jax.random.PRNGKey(0)
    kx, k1, k2, k3, k4 = jax.random.split(key, 5)

    # Deterministic PyTorch-like init: U(-1/sqrt(fan_in), 1/sqrt(fan_in)).
    fan_in = C * 3 * 3
    bound = 1.0 / (fan_in ** 0.5)
    x = jax.random.normal(kx, (N, C, H, W), dtype=jnp.float32)
    w1 = jax.random.uniform(k1, (C, C, 3, 3), jnp.float32, -bound, bound)
    b1 = jax.random.uniform(k2, (C,), jnp.float32, -bound, bound)
    w2 = jax.random.uniform(k3, (C, C, 3, 3), jnp.float32, -bound, bound)
    b2 = jax.random.uniform(k4, (C,), jnp.float32, -bound, bound)

    out = jax.jit(basic_block_forward)(x, w1, b1, w2, b2)
    out = jax.block_until_ready(out)

    ref = _reference(x, w1, b1, w2, b2)
    assert out.shape == (N, C, H, W)
    err = float(jnp.max(jnp.abs(out - ref)))
    assert jnp.allclose(out, ref, atol=5e-3, rtol=5e-3), f"max abs err {err}"

    print("KERNEL_OK")
</pallas_src>

<mosaic_0001>
module attributes {stable_mosaic.version = 11 : i64} {
  func.func @kernel(%arg0: memref<72x512xf32, #tpu.memory_space<vmem>>, %arg1: memref<8x512xf32, #tpu.memory_space<vmem>>, %arg2: memref<8x72xf32, #tpu.memory_space<vmem>>, %arg3: memref<8x1xf32, #tpu.memory_space<vmem>>, %arg4: memref<8x72xf32, #tpu.memory_space<vmem>>, %arg5: memref<8x1xf32, #tpu.memory_space<vmem>>, %arg6: memref<8x512xf32, #tpu.memory_space<vmem>>) attributes {dimension_semantics = [], scalar_prefetch = 0 : i64, scratch_operands = 0 : i64, tpu.core_type = #tpu.core_type<tc>} {
    %c0 = arith.constant 0 : index
    %c0_0 = arith.constant 0 : index
    %0 = vector.load %arg1[%c0, %c0_0] : memref<8x512xf32, #tpu.memory_space<vmem>>, vector<8x512xf32>
    %c0_1 = arith.constant 0 : index
    %c0_2 = arith.constant 0 : index
    %1 = vector.load %arg0[%c0_1, %c0_2] : memref<72x512xf32, #tpu.memory_space<vmem>>, vector<72x512xf32>
    %c0_3 = arith.constant 0 : index
    %c0_4 = arith.constant 0 : index
    %2 = vector.load %arg2[%c0_3, %c0_4] : memref<8x72xf32, #tpu.memory_space<vmem>>, vector<8x72xf32>
    %c0_5 = arith.constant 0 : index
    %c0_6 = arith.constant 0 : index
    %3 = vector.load %arg4[%c0_5, %c0_6] : memref<8x72xf32, #tpu.memory_space<vmem>>, vector<8x72xf32>
    %c0_7 = arith.constant 0 : index
    %c0_8 = arith.constant 0 : index
    %4 = vector.load %arg3[%c0_7, %c0_8] : memref<8x1xf32, #tpu.memory_space<vmem>>, vector<8x1xf32>
    %c0_9 = arith.constant 0 : index
    %c0_10 = arith.constant 0 : index
    %5 = vector.load %arg5[%c0_9, %c0_10] : memref<8x1xf32, #tpu.memory_space<vmem>>, vector<8x1xf32>
    %c17_i32 = arith.constant 17 : i32
    %6 = tpu.dynamic_rotate %0 by %c17_i32 dim 1 : vector<8x512xf32>, i32 -> vector<8x512xf32>
    %c16_i32 = arith.constant 16 : i32
    %7 = tpu.dynamic_rotate %0 by %c16_i32 dim 1 : vector<8x512xf32>, i32 -> vector<8x512xf32>
    %c15_i32 = arith.constant 15 : i32
    %8 = tpu.dynamic_rotate %0 by %c15_i32 dim 1 : vector<8x512xf32>, i32 -> vector<8x512xf32>
    %c1_i32 = arith.constant 1 : i32
    %9 = tpu.dynamic_rotate %0 by %c1_i32 dim 1 : vector<8x512xf32>, i32 -> vector<8x512xf32>
    %c511_i32 = arith.constant 511 : i32
    %10 = tpu.dynamic_rotate %0 by %c511_i32 dim 1 : vector<8x512xf32>, i32 -> vector<8x512xf32>
    %c497_i32 = arith.constant 497 : i32
    %11 = tpu.dynamic_rotate %0 by %c497_i32 dim 1 : vector<8x512xf32>, i32 -> vector<8x512xf32>
    %c496_i32 = arith.constant 496 : i32
    %12 = tpu.dynamic_rotate %0 by %c496_i32 dim 1 : vector<8x512xf32>, i32 -> vector<8x512xf32>
    %c495_i32 = arith.constant 495 : i32
    %13 = tpu.dynamic_rotate %0 by %c495_i32 dim 1 : vector<8x512xf32>, i32 -> vector<8x512xf32>
    %14 = tpu.concatenate %6, %7, %8, %9, %0, %10, %11, %12, %13 in 0 : vector<8x512xf32>, vector<8x512xf32>, vector<8x512xf32>, vector<8x512xf32>, vector<8x512xf32>, vector<8x512xf32>, vector<8x512xf32>, vector<8x512xf32>, vector<8x512xf32> -> vector<72x512xf32>
    %15 = arith.mulf %14, %1 : vector<72x512xf32>
    %cst = arith.constant dense<0.000000e+00> : vector<8x512xf32>
    %16 = tpu.matmul %2, %15, %cst {dimension_numbers = #tpu.dot_dimension_numbers<[1], [0], [0], [1], [0, 0, 1, 1], [], []>} : vector<8x72xf32>, vector<72x512xf32>, vector<8x512xf32> -> vector<8x512xf32>
    %17 = vector.broadcast %4 : vector<8x1xf32> to vector<8x512xf32>
    %18 = arith.addf %16, %17 : vector<8x512xf32>
    %cst_11 = arith.constant 0.000000e+00 : f32
    %19 = vector.broadcast %cst_11 : f32 to vector<8x512xf32>
    %20 = arith.maximumf %18, %19 : vector<8x512xf32>
    %c17_i32_12 = arith.constant 17 : i32
    %21 = tpu.dynamic_rotate %20 by %c17_i32_12 dim 1 : vector<8x512xf32>, i32 -> vector<8x512xf32>
    %c16_i32_13 = arith.constant 16 : i32
    %22 = tpu.dynamic_rotate %20 by %c16_i32_13 dim 1 : vector<8x512xf32>, i32 -> vector<8x512xf32>
    %c15_i32_14 = arith.constant 15 : i32
    %23 = tpu.dynamic_rotate %20 by %c15_i32_14 dim 1 : vector<8x512xf32>, i32 -> vector<8x512xf32>
    %c1_i32_15 = arith.constant 1 : i32
    %24 = tpu.dynamic_rotate %20 by %c1_i32_15 dim 1 : vector<8x512xf32>, i32 -> vector<8x512xf32>
    %c511_i32_16 = arith.constant 511 : i32
    %25 = tpu.dynamic_rotate %20 by %c511_i32_16 dim 1 : vector<8x512xf32>, i32 -> vector<8x512xf32>
    %c497_i32_17 = arith.constant 497 : i32
    %26 = tpu.dynamic_rotate %20 by %c497_i32_17 dim 1 : vector<8x512xf32>, i32 -> vector<8x512xf32>
    %c496_i32_18 = arith.constant 496 : i32
    %27 = tpu.dynamic_rotate %20 by %c496_i32_18 dim 1 : vector<8x512xf32>, i32 -> vector<8x512xf32>
    %c495_i32_19 = arith.constant 495 : i32
    %28 = tpu.dynamic_rotate %20 by %c495_i32_19 dim 1 : vector<8x512xf32>, i32 -> vector<8x512xf32>
    %29 = tpu.concatenate %21, %22, %23, %24, %20, %25, %26, %27, %28 in 0 : vector<8x512xf32>, vector<8x512xf32>, vector<8x512xf32>, vector<8x512xf32>, vector<8x512xf32>, vector<8x512xf32>, vector<8x512xf32>, vector<8x512xf32>, vector<8x512xf32> -> vector<72x512xf32>
    %30 = arith.mulf %29, %1 : vector<72x512xf32>
    %cst_20 = arith.constant dense<0.000000e+00> : vector<8x512xf32>
    %31 = tpu.matmul %3, %30, %cst_20 {dimension_numbers = #tpu.dot_dimension_numbers<[1], [0], [0], [1], [0, 0, 1, 1], [], []>} : vector<8x72xf32>, vector<72x512xf32>, vector<8x512xf32> -> vector<8x512xf32>
    %32 = vector.broadcast %5 : vector<8x1xf32> to vector<8x512xf32>
    %33 = arith.addf %31, %32 : vector<8x512xf32>
    %34 = arith.addf %0, %33 : vector<8x512xf32>
    %cst_21 = arith.constant 0.000000e+00 : f32
    %35 = vector.broadcast %cst_21 : f32 to vector<8x512xf32>
    %36 = arith.maximumf %34, %35 : vector<8x512xf32>
    %c0_22 = arith.constant 0 : index
    %c0_23 = arith.constant 0 : index
    %37 = vector.load %arg6[%c0_22, %c0_23] : memref<8x512xf32, #tpu.memory_space<vmem>>, vector<8x512xf32>
    tpu.vector_store %arg6[%c0_22, %c0_23], %36 {strides = array<i32>} : memref<8x512xf32, #tpu.memory_space<vmem>>, vector<8x512xf32>,
    return
  }
}

</mosaic_0001>

<bundles_post_ra>
// kernel: basic_block_forward.1
= control target key start
LH: loop header
LB: loop body
LE: loop exit
PB: predicated region body
PF: predicated region fallthrough
CT: control target
= control target key end

     0   :  { %s741_s25 = smov 17   ;;  %s742_s30 = smov 16   ;;  %v748_v4 = vmov 0.0   ;;  %v749_v5 = vmov 0   ;;  %v75_v7 = vlaneseq  ;;  %vm214_vm8 = vcmask 588800   ;;  %s1376_s1 = inlined_call_operand.vmem [shape: f32[8,512], index: 1, kind: input, shape index: {}]   ;;  %s1377_s3 = inlined_call_operand.vmem [shape: f32[8,1], index: 3, kind: input, shape index: {}]   ;;  %s1378_s0 = inlined_call_operand.vmem [shape: f32[72,512], index: 0, kind: input, shape index: {}]   ;;  %s1379_s2 = inlined_call_operand.vmem [shape: f32[8,72], index: 2, kind: input, shape index: {}]   ;;  %s1380_s5 = inlined_call_operand.vmem [shape: f32[8,1], index: 5, kind: input, shape index: {}]   ;;  %s1381_s4 = inlined_call_operand.vmem [shape: f32[8,72], index: 4, kind: input, shape index: {}]   ;;  %s1382_s6 = inlined_call_operand.vmem [shape: f32[8,512], index: 6, kind: output, shape index: {}]  }
   0x1   :  { %v789_v0 = vld [vmem:[%s1376_s1 + $0x10] sm:$0xff]  ;;  %v794_v1 = vld [vmem:[%s1376_s1] sm:$0xff]  ;;  %v803_v2 = vld [vmem:[%s1376_s1 + $0x18] sm:$0xff]  ;;  %s744_s7 = smov 1   ;;  %s745_s8 = smov 127   ;;  %282 = vmatprep.mubr.f32.mxu0 %v748_v4  ;;  %353 = vmatprep.mubr.f32.mxu1 %v748_v4 }
   0x2   :  { %71 = vrot.lane.b32.xlu1 %v789_v0, %s741_s25  ;;  %67 = vrot.lane.b32.xlu0 %v794_v1, %s741_s25  ;;  %1384 = vst [vmem:[#allocation2_spill] sm:$0xff] %v803_v2  ;;  %v808_v3 = vld [vmem:[%s1376_s1 + $0x8] sm:$0xff]  ;;  %s743_s1 = smov 15   ;;  %s746_s9 = smov 113   ;;  %v65_v6 = vld [vmem:[%s1377_s3] sm:$0xff]  ;;  %v875_v10 = vand.u32 127, %v75_v7 }
   0x3   :  { %s747_s10 = smov 112   ;;  %740 = vset.pattern.permute.xlu0 %v749_v5  ;;  %s750_s11 = smov 111   ;;  %v884_v14 = vld [vmem:[%s1378_s0 + $0x8] sm:$0xff]  ;;  %v894_v18 = vld [vmem:[%s1378_s0] sm:$0xff]  ;;  %v903_v21 = vld [vmem:[%s1378_s0 + $0x10] sm:$0xff] }
   0x4   :  { %vm77_vm0 = vcmp.lt.s32.totalorder %v875_v10, 17  ;;  %vm90_vm1 = vcmp.lt.s32.totalorder %v875_v10, 16  ;;  %v889_v15 = vld [vmem:[%s1378_s0 + $0x28] sm:$0xff]  ;;  %v910_v23 = vld [vmem:[%s1378_s0 + $0x20] sm:$0xff]  ;;  %v919_v27 = vld [vmem:[%s1378_s0 + $0x30] sm:$0xff]  ;;  %vm103_vm2 = vcmp.lt.s32.totalorder %v875_v10, 15 }
   0x5   :  { %v924_v28 = vld [vmem:[%s1378_s0 + $0x18] sm:$0xff]  ;;  %vm116_vm3 = vcmp.lt.s32.totalorder %v875_v10, 1  ;;  %v948_v49 = vld [vmem:[%s1378_s0 + $0x48] sm:$0xff]  ;;  %v960_v54 = vld [vmem:[%s1378_s0 + $0x40] sm:$0xff]  ;;  %vm129_vm4 = vcmp.lt.s32.totalorder %v875_v10, 127  ;;  %vm155_vm5 = vcmp.lt.s32.totalorder %v875_v10, 112 }
   0x6   :  { %73 = vrot.lane.b32.xlu1 %v803_v2, %s741_s25  ;;  %69 = vrot.lane.b32.xlu0 %v808_v3, %s741_s25  ;;  %v929_v29 = vld [vmem:[%s1378_s0 + $0x38] sm:$0xff]  ;;  %v955_v51 = vld [vmem:[%s1378_s0 + $0x68] sm:$0xff]  ;;  %vm142_vm6 = vcmp.lt.s32.totalorder %v875_v10, 113  ;;  %vm168_vm7 = vcmp.lt.s32.totalorder %v875_v10, 111 }
   0x7   :  { %v970_v58 = vld [vmem:[%s1378_s0 + $0x50] sm:$0xff]  ;;  %v975_v59 = vld [vmem:[%s1378_s0 + $0x58] sm:$0xff]  ;;  %v985_v63 = vld [vmem:[%s1378_s0 + $0x60] sm:$0xff] }
   0x8   :  { %v990_v5 = vld [vmem:[%s1378_s0 + $0x70] sm:$0xff] }
   0xa   :  { %84 = vrot.lane.b32.xlu1 %v808_v3, %s742_s30  ;;  %82 = vrot.lane.b32.xlu0 %v794_v1, %s742_s30 }
   0xe   :  { %88 = vrot.lane.b32.xlu1 %v803_v2, %s742_s30  ;;  %86 = vrot.lane.b32.xlu0 %v789_v0, %s742_s30 }
  0x12   :  { %97 = vrot.lane.b32.xlu1 %v808_v3, %s743_s1  ;;  %95 = vrot.lane.b32.xlu0 %v794_v1, %s743_s1 }
  0x16   :  { %101 = vrot.lane.b32.xlu1 %v803_v2, %s743_s1  ;;  %99 = vrot.lane.b32.xlu0 %v789_v0, %s743_s1 }
  0x1a   :  { %110 = vrot.lane.b32.xlu1 %v808_v3, %s744_s7  ;;  %108 = vrot.lane.b32.xlu0 %v794_v1, %s744_s7 }
  0x1e   :  { %114 = vrot.lane.b32.xlu1 %v803_v2, %s744_s7  ;;  %112 = vrot.lane.b32.xlu0 %v789_v0, %s744_s7 }
  0x22   :  { %123 = vrot.lane.b32.xlu1 %v808_v3, %s745_s8  ;;  %121 = vrot.lane.b32.xlu0 %v794_v1, %s745_s8 }
  0x26   :  { %127 = vrot.lane.b32.xlu1 %v803_v2, %s745_s8  ;;  %125 = vrot.lane.b32.xlu0 %v789_v0, %s745_s8 }
  0x2a   :  { %136 = vrot.lane.b32.xlu1 %v808_v3, %s746_s9  ;;  %134 = vrot.lane.b32.xlu0 %v794_v1, %s746_s9 }
  0x2e   :  { %140 = vrot.lane.b32.xlu1 %v803_v2, %s746_s9  ;;  %138 = vrot.lane.b32.xlu0 %v789_v0, %s746_s9 }
  0x32   :  { %149 = vrot.lane.b32.xlu1 %v808_v3, %s747_s10  ;;  %147 = vrot.lane.b32.xlu0 %v794_v1, %s747_s10 }
  0x36   :  { %153 = vrot.lane.b32.xlu1 %v803_v2, %s747_s10  ;;  %151 = vrot.lane.b32.xlu0 %v789_v0, %s747_s10 }
  0x3a   :  { %162 = vrot.lane.b32.xlu1 %v808_v3, %s750_s11  ;;  %160 = vrot.lane.b32.xlu0 %v794_v1, %s750_s11 }
  0x3e   :  { %166 = vrot.lane.b32.xlu1 %v803_v2, %s750_s11  ;;  %164 = vrot.lane.b32.xlu0 %v789_v0, %s750_s11 }
  0x42   :  { %211 = vperm.xlu0 %740, %v65_v6   ;;  %v995_v6 = vld [vmem:[%s1378_s0 + $0x78] sm:$0xff] }
  0x74   :  { %v72_v8 = vpop.permute.xlu1 %71  ;;  %v68_v9 = vpop.permute.xlu0 %67 }
  0x78   :  { %v74_v11 = vpop.permute.xlu1 %73  ;;  %v70_v12 = vpop.permute.xlu0 %69 }
  0x79   :  { %v80_v13 = vsel %vm77_vm0, %v68_v9, %v70_v12  ;;  %v81_v19 = vsel %vm77_vm0, %v74_v11, %v68_v9  ;;  %v79_v22 = vsel %vm77_vm0, %v70_v12, %v72_v8  ;;  %v78_v26 = vsel %vm77_vm0, %v72_v8, %v74_v11 }
  0x7a   :  { %v174_v24 = vmul.f32 %v80_v13, %v884_v14  ;;  %v173_v30 = vmul.f32 %v81_v19, %v894_v18  ;;  %v175_v34 = vmul.f32 %v79_v22, %v903_v21  ;;  %v176_v40 = vmul.f32 %v78_v26, %v924_v28 }
  0x7c   :  { %v85_v16 = vpop.permute.xlu1 %84  ;;  %v83_v17 = vpop.permute.xlu0 %82 }
  0x7d   :  { %v93_v20 = vsel %vm90_vm1, %v83_v17, %v85_v16 }
  0x7e   :  { %v178_v25 = vmul.f32 %v93_v20, %v889_v15 }
  0x80   :  { %v89_v31 = vpop.permute.xlu1 %88  ;;  %v87_v32 = vpop.permute.xlu0 %86  ;;  %v666_v33 = vpack.c.bf16 %v178_v25, %v174_v24 }
  0x81   :  { %v94_v35 = vsel %vm90_vm1, %v89_v31, %v83_v17  ;;  %v91_v36 = vsel %vm90_vm1, %v87_v32, %v89_v31  ;;  %v92_v37 = vsel %vm90_vm1, %v85_v16, %v87_v32 }
  0x82   :  { %v177_v38 = vmul.f32 %v94_v35, %v910_v23  ;;  %v179_v39 = vmul.f32 %v92_v37, %v919_v27  ;;  %667 = vmatprep.subr.bf16.mxu0 %v666_v33  ;;  %v180_v41 = vmul.f32 %v91_v36, %v929_v29  ;;  %v1013_v33 = vld [vmem:[%s1378_s0 + $0x80] sm:$0xff]  ;;  %v1023_v35 = vld [vmem:[%s1378_s0 + $0x98] sm:$0xff]  ;;  %v1028_v36 = vld [vmem:[%s1378_s0 + $0x90] sm:$0xff] }
  0x83   :  { %v1033_v37 = vld [vmem:[%s1378_s0 + $0xa0] sm:$0xff] }
  0x84   :  { %v98_v42 = vpop.permute.xlu1 %97  ;;  %v96_v43 = vpop.permute.xlu0 %95  ;;  %v668_v44 = vpack.c.bf16 %v177_v38, %v173_v30  ;;  %v682_v45 = vpack.c.bf16 %v180_v41, %v176_v40  ;;  %v684_v46 = vpack.c.bf16 %v179_v39, %v175_v34  ;;  %v1018_v34 = vld [vmem:[%s1378_s0 + $0x88] sm:$0xff]  ;;  %v1040_v39 = vld [vmem:[%s1378_s0 + $0xb8] sm:$0xff]  ;;  %v1050_v41 = vld [vmem:[%s1378_s0 + $0xb0] sm:$0xff] }
  0x85   :  { %v106_v50 = vsel %vm103_vm2, %v96_v43, %v98_v42  ;;  %v1045_v40 = vld [vmem:[%s1378_s0 + $0xa8] sm:$0xff] }
  0x86   :  { %669 = vmatpush1.bf16.msra.mxu0 %v668_v44  ;;  %683 = vmatprep.subr.bf16.mxu1 %v682_v45  ;;  %v182_v57 = vmul.f32 %v106_v50, %v948_v49  ;;  %v190_v44 = vmul.f32 %v1018_v34, %v808_v3  ;;  %v192_v45 = vmul.f32 %v1023_v35, %v803_v2 }
  0x87   :  { %685 = vmatpush1.bf16.msra.mxu1 %v684_v46  ;;  %v189_v46 = vmul.f32 %v1013_v33, %v794_v1 }
  0x88   :  { %v102_v47 = vpop.permute.xlu1 %101  ;;  %v100_v48 = vpop.permute.xlu0 %99 }
  0x89   :  { %v107_v55 = vsel %vm103_vm2, %v102_v47, %v96_v43  ;;  %v105_v60 = vsel %vm103_vm2, %v98_v42, %v100_v48  ;;  %v104_v62 = vsel %vm103_vm2, %v100_v48, %v102_v47  ;;  %v191_v47 = vmul.f32 %v1028_v36, %v789_v0 }
  0x8a   :  { %v181_v7 = vmul.f32 %v107_v55, %v960_v54  ;;  %v183_v12 = vmul.f32 %v105_v60, %v970_v58  ;;  %v184_v19 = vmul.f32 %v104_v62, %v975_v59 }
  0x8c   :  { %v111_v52 = vpop.permute.xlu1 %110  ;;  %v109_v53 = vpop.permute.xlu0 %108 }
  0x8d   :  { %v119_v56 = vsel %vm116_vm3, %v109_v53, %v111_v52 }
  0x8e   :  { %v186_v61 = vmul.f32 %v119_v56, %v955_v51 }
  0x90   :  { %v115_v8 = vpop.permute.xlu1 %114  ;;  %v113_v9 = vpop.permute.xlu0 %112  ;;  %v670_v11 = vpack.c.bf16 %v186_v61, %v182_v57 }
  0x91   :  { %v120_v13 = vsel %vm116_vm3, %v115_v8, %v109_v53  ;;  %v117_v16 = vsel %vm116_vm3, %v113_v9, %v115_v8  ;;  %v118_v17 = vsel %vm116_vm3, %v111_v52, %v113_v9 }
  0x92   :  { %v185_v20 = vmul.f32 %v120_v13, %v985_v63  ;;  %v187_v22 = vmul.f32 %v118_v17, %v990_v5  ;;  %v188_v24 = vmul.f32 %v117_v16, %v995_v6  ;;  %671 = vmatprep.subr.bf16.mxu0 %v670_v11  ;;  %v1075_v17 = vld [vmem:[%s1378_s0 + $0xd8] sm:$0xff] }
  0x94   :  { %v124_v25 = vpop.permute.xlu1 %123  ;;  %v122_v26 = vpop.permute.xlu0 %121  ;;  %v672_v30 = vpack.c.bf16 %v185_v20, %v181_v7  ;;  %v686_v31 = vpack.c.bf16 %v188_v24, %v184_v19  ;;  %v688_v32 = vpack.c.bf16 %v187_v22, %v183_v12  ;;  %v1082_v20 = vld [vmem:[%s1378_s0 + $0xc8] sm:$0xff]  ;;  %v1089_v24 = vld [vmem:[%s1378_s0 + $0xd0] sm:$0xff] }
  0x95   :  { %v132_v38 = vsel %vm129_vm4, %v122_v26, %v124_v25 }
  0x96   :  { %673 = vmatpush1.bf16.msra.mxu0 %v672_v30  ;;  %687 = vmatprep.subr.bf16.mxu1 %v686_v31  ;;  %v193_v48 = vmul.f32 %v132_v38, %v1033_v37  ;;  %v1103_v31 = vld [vmem:[%s1378_s0 + $0xf8] sm:$0xff]  ;;  %v1113_v38 = vld [vmem:[%s1378_s0 + $0xf0] sm:$0xff] }
  0x97   :  { %689 = vmatpush1.bf16.msra.mxu1 %v688_v32  ;;  %v1108_v32 = vld [vmem:[%s1378_s0 + $0xe8] sm:$0xff] }
  0x98   :  { %v128_v42 = vpop.permute.xlu1 %127  ;;  %v126_v43 = vpop.permute.xlu0 %125  ;;  %v676_v9 = vpack.c.bf16 %v193_v48, %v189_v46 }
  0x99   :  { %v133_v50 = vsel %vm129_vm4, %v128_v42, %v122_v26  ;;  %v130_v52 = vsel %vm129_vm4, %v126_v43, %v128_v42  ;;  %v131_v53 = vsel %vm129_vm4, %v124_v25, %v126_v43  ;;  %v1094_v25 = vld [vmem:[%s1378_s0 + $0xe0] sm:$0xff] }
  0x9a   :  { %v196_v55 = vmul.f32 %v133_v50, %v1040_v39  ;;  %v194_v56 = vmul.f32 %v131_v53, %v1045_v40  ;;  %v195_v57 = vmul.f32 %v130_v52, %v1050_v41  ;;  %v1118_v42 = vld [vmem:[%s1378_s0 + $0xc0] sm:$0xff] }
  0x9c   :  { %v137_v60 = vpop.permute.xlu1 %136  ;;  %v135_v61 = vpop.permute.xlu0 %134  ;;  %v674_v62 = vpack.c.bf16 %v194_v56, %v190_v44  ;;  %v690_v7 = vpack.c.bf16 %v196_v55, %v192_v45  ;;  %v692_v8 = vpack.c.bf16 %v195_v57, %v191_v47 }
  0x9d   :  { %v145_v43 = vsel %vm142_vm6, %v135_v61, %v137_v60 }
  0x9e   :  { %675 = vmatprep.subr.bf16.mxu0 %v674_v62  ;;  %691 = vmatprep.subr.bf16.mxu1 %v690_v7 }
  0x9f   :  { %677 = vmatpush1.bf16.msra.mxu0 %v676_v9  ;;  %693 = vmatpush1.bf16.msra.mxu1 %v692_v8 }
  0xa0   :  { %v141_v11 = vpop.permute.xlu1 %140  ;;  %v139_v12 = vpop.permute.xlu0 %138 }
  0xa1   :  { %v146_v19 = vsel %vm142_vm6, %v141_v11, %v135_v61  ;;  %v144_v22 = vsel %vm142_vm6, %v137_v60, %v139_v12  ;;  %v143_v30 = vsel %vm142_vm6, %v139_v12, %v141_v11  ;;  %v197_v61 = vmul.f32 %v145_v43, %v1118_v42 }
  0xa2   :  { %v200_v44 = vmul.f32 %v146_v19, %v1075_v17  ;;  %v198_v45 = vmul.f32 %v144_v22, %v1082_v20  ;;  %v199_v55 = vmul.f32 %v143_v30, %v1089_v24  ;;  %v1150_v19 = vld [vmem:[%s1378_s0 + $0x110] sm:$0xff]  ;;  %v1155_v22 = vld [vmem:[%s1378_s0 + $0x100] sm:$0xff] }
  0xa4   :  { %v150_v13 = vpop.permute.xlu1 %149  ;;  %v148_v16 = vpop.permute.xlu0 %147 }
  0xa5   :  { %v158_v26 = vsel %vm155_vm5, %v148_v16, %v150_v13 }
  0xa6   :  { %v201_v48 = vmul.f32 %v158_v26, %v1094_v25 }
  0xa8   :  { %v154_v46 = vpop.permute.xlu1 %153  ;;  %v152_v47 = vpop.permute.xlu0 %151  ;;  %v680_v12 = vpack.c.bf16 %v201_v48, %v197_v61 }
  0xa9   :  { %v159_v50 = vsel %vm155_vm5, %v154_v46, %v148_v16  ;;  %v156_v52 = vsel %vm155_vm5, %v152_v47, %v154_v46  ;;  %v157_v53 = vsel %vm155_vm5, %v150_v13, %v152_v47  ;;  %v1140_v13 = vld [vmem:[%s1378_s0 + $0x118] sm:$0xff]  ;;  %v1145_v16 = vld [vmem:[%s1378_s0 + $0x108] sm:$0xff] }
  0xaa   :  { %v204_v56 = vmul.f32 %v159_v50, %v1103_v31  ;;  %v202_v57 = vmul.f32 %v157_v53, %v1108_v32  ;;  %v203_v60 = vmul.f32 %v156_v52, %v1113_v38  ;;  %v63_v53 = vld [vmem:[%s1379_s2] sm:$0xff] }
  0xac   :  { %v163_v62 = vpop.permute.xlu1 %162  ;;  %v161_v7 = vpop.permute.xlu0 %160  ;;  %v678_v8 = vpack.c.bf16 %v202_v57, %v198_v45  ;;  %v694_v9 = vpack.c.bf16 %v204_v56, %v200_v44  ;;  %v696_v11 = vpack.c.bf16 %v203_v60, %v199_v55 }
  0xad   :  { %v171_v26 = vsel %vm168_vm7, %v161_v7, %v163_v62 }
  0xae   :  { %679 = vmatprep.subr.bf16.mxu0 %v678_v8  ;;  %695 = vmatprep.subr.bf16.mxu1 %v694_v9  ;;  %v205_v52 = vmul.f32 %v171_v26, %v1155_v22 }
  0xaf   :  { %681 = vmatpush1.bf16.msra.mxu0 %v680_v12  ;;  %697 = vmatpush1.bf16.msra.mxu1 %v696_v11 }
  0xb0   :  { %v167_v30 = vpop.permute.xlu1 %166  ;;  %v165_v43 = vpop.permute.xlu0 %164 }
  0xb1   :  { %v172_v44 = vsel %vm168_vm7, %v167_v30, %v161_v7  ;;  %v169_v45 = vsel %vm168_vm7, %v165_v43, %v167_v30  ;;  %v170_v46 = vsel %vm168_vm7, %v163_v62, %v165_v43  ;;  %v66_v30 = vld [vmem:[%s1380_s5] sm:$0xff] }
  0xb2   :  { %v208_v47 = vmul.f32 %v172_v44, %v1140_v13  ;;  %v206_v48 = vmul.f32 %v170_v46, %v1145_v16  ;;  %v207_v50 = vmul.f32 %v169_v45, %v1150_v19 }
  0xb4   :  { %234 = vmatprep.subr.mxu0 %v206_v48  ;;  %305 = vmatprep.subr.mxu1 %v208_v47 }
  0xb5   :  { %235 = vmatpush1.msra.mxu0 %v205_v52  ;;  %306 = vmatpush1.msra.mxu1 %v207_v50 }
  0xb6   :  { %662 = vmatmul.mubr.msk.f32.vlgmr.msra.gmra.mrb[0].mxu0 %vm214_vm8, %v63_v53  ;;  %663 = vmatmul.mubr.msk.f32.vlgmr.msra.gmra.mrb[0].mxu1 %vm214_vm8, %v63_v53 }
  0xb7   :  { %568 = vmatprep.mubr.f32.mxu0 %v748_v4  ;;  %639 = vmatprep.mubr.f32.mxu1 %v748_v4 }
  0xc1   :  { %v212_v55 = vpop.permute.xlu0 %211 }
 0x189   :  { %v284_v56 = vpop.f32.mrb[0].mxu0  ;;  %v355_v57 = vpop.f32.mrb[0].mxu1 }
 0x18a   :  { %v285_v60 = vadd.f32 %v284_v56, %v212_v55  ;;  %v356_v61 = vadd.f32 %v355_v57, %v212_v55  ;;  %v286_v62 = vpop.f32.mrb[1].mxu0  ;;  %v357_v7 = vpop.f32.mrb[1].mxu1 }
 0x18b   :  { %v287_v11 = vadd.f32 %v286_v62, %v212_v55  ;;  %v358_v4 = vadd.f32 %v357_v7, %v212_v55 }
 0x18c   :  { %v1176_v8 = vmax.f32 %v285_v60, 0.0  ;;  %v1178_v9 = vmax.f32 %v356_v61, 0.0 }
 0x18d   :  { %v1184_v12 = vmax.f32 %v287_v11, 0.0  ;;  %v1190_v26 = vmax.f32 %v358_v4, 0.0 }
 0x18e   :  { %368 = vrot.lane.b32.xlu0 %v1178_v9, %s741_s25  ;;  %364 = vrot.lane.b32.xlu1 %v1176_v8, %s741_s25 }
 0x192   :  { %376 = vrot.lane.b32.xlu0 %v1176_v8, %s742_s30  ;;  %366 = vrot.lane.b32.xlu1 %v1184_v12, %s741_s25 }
 0x196   :  { %380 = vrot.lane.b32.xlu0 %v1178_v9, %s742_s30  ;;  %370 = vrot.lane.b32.xlu1 %v1190_v26, %s741_s25 }
 0x19a   :  { %388 = vrot.lane.b32.xlu0 %v1176_v8, %s743_s1  ;;  %378 = vrot.lane.b32.xlu1 %v1184_v12, %s742_s30 }
 0x19e   :  { %392 = vrot.lane.b32.xlu0 %v1178_v9, %s743_s1  ;;  %382 = vrot.lane.b32.xlu1 %v1190_v26, %s742_s30 }
 0x1a2   :  { %400 = vrot.lane.b32.xlu0 %v1176_v8, %s744_s7  ;;  %390 = vrot.lane.b32.xlu1 %v1184_v12, %s743_s1 }
 0x1a6   :  { %404 = vrot.lane.b32.xlu0 %v1178_v9, %s744_s7  ;;  %394 = vrot.lane.b32.xlu1 %v1190_v26, %s743_s1 }
 0x1aa   :  { %412 = vrot.lane.b32.xlu0 %v1176_v8, %s745_s8  ;;  %402 = vrot.lane.b32.xlu1 %v1184_v12, %s744_s7 }
 0x1ae   :  { %416 = vrot.lane.b32.xlu0 %v1178_v9, %s745_s8  ;;  %406 = vrot.lane.b32.xlu1 %v1190_v26, %s744_s7 }
 0x1b2   :  { %424 = vrot.lane.b32.xlu0 %v1176_v8, %s746_s9  ;;  %414 = vrot.lane.b32.xlu1 %v1184_v12, %s745_s8 }
 0x1b6   :  { %428 = vrot.lane.b32.xlu0 %v1178_v9, %s746_s9  ;;  %418 = vrot.lane.b32.xlu1 %v1190_v26, %s745_s8 }
 0x1ba   :  { %436 = vrot.lane.b32.xlu0 %v1176_v8, %s747_s10  ;;  %426 = vrot.lane.b32.xlu1 %v1184_v12, %s746_s9 }
 0x1be   :  { %440 = vrot.lane.b32.xlu0 %v1178_v9, %s747_s10  ;;  %430 = vrot.lane.b32.xlu1 %v1190_v26, %s746_s9 }
 0x1c2   :  { %448 = vrot.lane.b32.xlu0 %v1176_v8, %s750_s11  ;;  %438 = vrot.lane.b32.xlu1 %v1184_v12, %s747_s10 }
 0x1c6   :  { %452 = vrot.lane.b32.xlu0 %v1178_v9, %s750_s11  ;;  %442 = vrot.lane.b32.xlu1 %v1190_v26, %s747_s10 }
 0x1ca   :  { %498 = vperm.xlu0 %740, %v66_v30   ;;  %450 = vrot.lane.b32.xlu1 %v1184_v12, %s750_s11 }
 0x1ce   :  { %454 = vrot.lane.b32.xlu1 %v1190_v26, %s750_s11 }
 0x200   :  { %v369_v43 = vpop.permute.xlu0 %368  ;;  %v365_v44 = vpop.permute.xlu1 %364 }
 0x204   :  { %v377_v45 = vpop.permute.xlu0 %376  ;;  %v367_v46 = vpop.permute.xlu1 %366 }
 0x205   :  { %v374_v50 = vsel %vm77_vm0, %v365_v44, %v367_v46  ;;  %v373_v7 = vsel %vm77_vm0, %v367_v46, %v369_v43 }
 0x206   :  { %v461_v56 = vmul.f32 %v374_v50, %v884_v14 }
 0x208   :  { %v381_v47 = vpop.permute.xlu0 %380  ;;  %v371_v48 = vpop.permute.xlu1 %370 }
 0x209   :  { %v372_v61 = vsel %vm77_vm0, %v369_v43, %v371_v48  ;;  %v375_v62 = vsel %vm77_vm0, %v371_v48, %v365_v44  ;;  %v462_v43 = vmul.f32 %v373_v7, %v903_v21 }
 0x20a   :  { %v460_v50 = vmul.f32 %v375_v62, %v894_v18 }
 0x20c   :  { %v389_v52 = vpop.permute.xlu0 %388  ;;  %v379_v53 = vpop.permute.xlu1 %378 }
 0x20d   :  { %v386_v55 = vsel %vm90_vm1, %v377_v45, %v379_v53  ;;  %v385_v57 = vsel %vm90_vm1, %v379_v53, %v381_v47  ;;  %v463_v53 = vmul.f32 %v372_v61, %v924_v28 }
 0x20e   :  { %v465_v60 = vmul.f32 %v386_v55, %v889_v15  ;;  %v466_v2 = vmul.f32 %v385_v57, %v919_v27 }
 0x210   :  { %v393_v11 = vpop.permute.xlu0 %392  ;;  %v383_v4 = vpop.permute.xlu1 %382  ;;  %v698_v30 = vpack.c.bf16 %v465_v60, %v461_v56  ;;  %v716_v57 = vpack.c.bf16 %v466_v2, %v462_v43 }
 0x211   :  { %v384_v14 = vsel %vm90_vm1, %v381_v47, %v383_v4  ;;  %v387_v15 = vsel %vm90_vm1, %v383_v4, %v377_v45 }
 0x212   :  { %v464_v44 = vmul.f32 %v387_v15, %v910_v23  ;;  %v467_v48 = vmul.f32 %v384_v14, %v929_v29  ;;  %699 = vmatprep.subr.bf16.mxu0 %v698_v30 }
 0x214   :  { %v700_v46 = vpack.c.bf16 %v464_v44, %v460_v50  ;;  %v401_v55 = vpop.permute.xlu0 %400  ;;  %v391_v27 = vpop.permute.xlu1 %390  ;;  %v714_v56 = vpack.c.bf16 %v467_v48, %v463_v53 }
 0x215   :  { %v398_v18 = vsel %vm103_vm2, %v389_v52, %v391_v27  ;;  %v397_v7 = vsel %vm103_vm2, %v391_v27, %v393_v11 }
 0x216   :  { %701 = vmatpush1.bf16.msra.mxu0 %v700_v46  ;;  %715 = vmatprep.subr.bf16.mxu1 %v714_v56  ;;  %v469_v21 = vmul.f32 %v398_v18, %v948_v49 }
 0x217   :  { %717 = vmatpush1.bf16.msra.mxu1 %v716_v57 }
 0x218   :  { %v405_v45 = vpop.permute.xlu0 %404  ;;  %v395_v47 = vpop.permute.xlu1 %394 }
 0x219   :  { %v396_v61 = vsel %vm103_vm2, %v393_v11, %v395_v47  ;;  %v399_v62 = vsel %vm103_vm2, %v395_v47, %v389_v52  ;;  %v470_v11 = vmul.f32 %v397_v7, %v970_v58  ;;  %v477_v58 = vmul.f32 %v1184_v12, %v1018_v34 }
 0x21a   :  { %v468_v50 = vmul.f32 %v399_v62, %v960_v54  ;;  %v471_v53 = vmul.f32 %v396_v61, %v975_v59  ;;  %v476_v59 = vmul.f32 %v1176_v8, %v1013_v33  ;;  %v479_v34 = vmul.f32 %v1190_v26, %v1023_v35 }
 0x21c   :  { %v413_v28 = vpop.permute.xlu0 %412  ;;  %v403_v23 = vpop.permute.xlu1 %402 }
 0x21d   :  { %v410_v29 = vsel %vm116_vm3, %v401_v55, %v403_v23  ;;  %v409_v60 = vsel %vm116_vm3, %v403_v23, %v405_v45 }
 0x21e   :  { %v473_v2 = vmul.f32 %v410_v29, %v955_v51  ;;  %v474_v15 = vmul.f32 %v409_v60, %v990_v5 }
 0x220   :  { %v417_v4 = vpop.permute.xlu0 %416  ;;  %v407_v30 = vpop.permute.xlu1 %406  ;;  %v702_v14 = vpack.c.bf16 %v473_v2, %v469_v21  ;;  %v720_v27 = vpack.c.bf16 %v474_v15, %v470_v11 }
 0x221   :  { %v408_v49 = vsel %vm116_vm3, %v405_v45, %v407_v30  ;;  %v411_v51 = vsel %vm116_vm3, %v407_v30, %v401_v55 }
 0x222   :  { %v472_v52 = vmul.f32 %v411_v51, %v985_v63  ;;  %v475_v44 = vmul.f32 %v408_v49, %v995_v6  ;;  %703 = vmatprep.subr.bf16.mxu0 %v702_v14 }
 0x224   :  { %v704_v48 = vpack.c.bf16 %v472_v52, %v468_v50  ;;  %v425_v43 = vpop.permute.xlu0 %424  ;;  %v415_v5 = vpop.permute.xlu1 %414  ;;  %v718_v46 = vpack.c.bf16 %v475_v44, %v471_v53 }
 0x225   :  { %v421_v56 = vsel %vm129_vm4, %v415_v5, %v417_v4  ;;  %v422_v54 = vsel %vm129_vm4, %v413_v28, %v415_v5 }
 0x226   :  { %v480_v63 = vmul.f32 %v422_v54, %v1033_v37  ;;  %v481_v6 = vmul.f32 %v421_v56, %v1045_v40  ;;  %705 = vmatpush1.bf16.msra.mxu0 %v704_v48  ;;  %719 = vmatprep.subr.bf16.mxu1 %v718_v46  ;;  %v478_v37 = vmul.f32 %v1178_v9, %v1028_v36 }
 0x227   :  { %721 = vmatpush1.bf16.msra.mxu1 %v720_v27 }
 0x228   :  { %v708_v55 = vpack.c.bf16 %v480_v63, %v476_v59  ;;  %v429_v57 = vpop.permute.xlu0 %428  ;;  %v419_v45 = vpop.permute.xlu1 %418  ;;  %v706_v47 = vpack.c.bf16 %v481_v6, %v477_v58 }
 0x229   :  { %v420_v18 = vsel %vm129_vm4, %v417_v4, %v419_v45  ;;  %v423_v33 = vsel %vm129_vm4, %v419_v45, %v413_v28 }
 0x22a   :  { %v482_v40 = vmul.f32 %v420_v18, %v1050_v41  ;;  %v483_v8 = vmul.f32 %v423_v33, %v1040_v39  ;;  %707 = vmatprep.subr.bf16.mxu0 %v706_v47  ;;  %v1385_v18 = vld [vmem:[#allocation2_spill] sm:$0xff] }
 0x22b   :  { %709 = vmatpush1.bf16.msra.mxu0 %v708_v55 }
 0x22c   :  { %v724_v12 = vpack.c.bf16 %v482_v40, %v478_v37  ;;  %v437_v23 = vpop.permute.xlu0 %436  ;;  %v427_v29 = vpop.permute.xlu1 %426  ;;  %v722_v21 = vpack.c.bf16 %v483_v8, %v479_v34 }
 0x22d   :  { %v433_v36 = vsel %vm142_vm6, %v427_v29, %v429_v57  ;;  %v434_v41 = vsel %vm142_vm6, %v425_v43, %v427_v29 }
 0x22e   :  { %723 = vmatprep.subr.bf16.mxu1 %v722_v21  ;;  %v484_v26 = vmul.f32 %v434_v41, %v1118_v42  ;;  %v485_v2 = vmul.f32 %v433_v36, %v1082_v20 }
 0x22f   :  { %725 = vmatpush1.bf16.msra.mxu1 %v724_v12 }
 0x230   :  { %v441_v60 = vpop.permute.xlu0 %440  ;;  %v431_v28 = vpop.permute.xlu1 %430 }
 0x231   :  { %v432_v4 = vsel %vm142_vm6, %v429_v57, %v431_v28  ;;  %v435_v30 = vsel %vm142_vm6, %v431_v28, %v425_v43 }
 0x232   :  { %v486_v42 = vmul.f32 %v432_v4, %v1089_v24 }
 0x234   :  { %v439_v39 = vpop.permute.xlu1 %438  ;;  %v449_v61 = vpop.permute.xlu0 %448 }
 0x235   :  { %v445_v9 = vsel %vm155_vm5, %v439_v39, %v441_v60  ;;  %v446_v35 = vsel %vm155_vm5, %v437_v23, %v439_v39 }
 0x236   :  { %v488_v62 = vmul.f32 %v446_v35, %v1094_v25  ;;  %v489_v7 = vmul.f32 %v445_v9, %v1108_v32  ;;  %v487_v25 = vmul.f32 %v435_v30, %v1075_v17 }
 0x238   :  { %v712_v14 = vpack.c.bf16 %v488_v62, %v484_v26  ;;  %v443_v15 = vpop.permute.xlu1 %442  ;;  %v710_v49 = vpack.c.bf16 %v489_v7, %v485_v2  ;;  %v453_v53 = vpop.permute.xlu0 %452 }
 0x239   :  { %v444_v51 = vsel %vm155_vm5, %v441_v60, %v443_v15  ;;  %v447_v20 = vsel %vm155_vm5, %v443_v15, %v437_v23 }
 0x23a   :  { %v490_v32 = vmul.f32 %v444_v51, %v1113_v38  ;;  %v491_v50 = vmul.f32 %v447_v20, %v1103_v31  ;;  %711 = vmatprep.subr.bf16.mxu0 %v710_v49  ;;  %v64_v31 = vld [vmem:[%s1381_s4] sm:$0xff] }
 0x23b   :  { %713 = vmatpush1.bf16.msra.mxu0 %v712_v14 }
 0x23c   :  { %v728_v52 = vpack.c.bf16 %v490_v32, %v486_v42  ;;  %v451_v44 = vpop.permute.xlu1 %450  ;;  %v726_v11 = vpack.c.bf16 %v491_v50, %v487_v25 }
 0x23d   :  { %v457_v48 = vsel %vm168_vm7, %v451_v44, %v453_v53  ;;  %v458_v43 = vsel %vm168_vm7, %v449_v61, %v451_v44 }
 0x23e   :  { %v492_v24 = vmul.f32 %v458_v43, %v1155_v22  ;;  %v493_v17 = vmul.f32 %v457_v48, %v1145_v16  ;;  %727 = vmatprep.subr.bf16.mxu1 %v726_v11 }
 0x23f   :  { %729 = vmatpush1.bf16.msra.mxu1 %v728_v52 }
 0x240   :  { %v455_v38 = vpop.permute.xlu1 %454  ;;  %520 = vmatprep.subr.mxu0 %v493_v17 }
 0x241   :  { %v456_v5 = vsel %vm168_vm7, %v453_v53, %v455_v38  ;;  %v459_v46 = vsel %vm168_vm7, %v455_v38, %v449_v61  ;;  %521 = vmatpush1.msra.mxu0 %v492_v24 }
 0x242   :  { %v494_v27 = vmul.f32 %v456_v5, %v1150_v19  ;;  %v495_v22 = vmul.f32 %v459_v46, %v1140_v13  ;;  %664 = vmatmul.mubr.msk.f32.vlgmr.msra.gmra.mrb[2].mxu0 %vm214_vm8, %v64_v31 }
 0x244   :  { %591 = vmatprep.subr.mxu1 %v495_v22 }
 0x245   :  { %592 = vmatpush1.msra.mxu1 %v494_v27 }
 0x246   :  { %665 = vmatmul.mubr.msk.f32.vlgmr.msra.gmra.mrb[2].mxu1 %vm214_vm8, %v64_v31 }
 0x249   :  { %v499_v16 = vpop.permute.xlu0 %498 }
 0x315   :  { %v570_v56 = vpop.f32.mrb[2].mxu0 }
 0x316   :  { %v571_v54 = vadd.f32 %v570_v56, %v499_v16  ;;  %v572_v59 = vpop.f32.mrb[3].mxu0 }
 0x317   :  { %v573_v63 = vadd.f32 %v572_v59, %v499_v16 }
 0x318   :  { %v646_v6 = vadd.f32 %v571_v54, %v794_v1 }
 0x319   :  { %v647_v10 = vadd.f32 %v573_v63, %v808_v3  ;;  %v641_v58 = vpop.f32.mrb[2].mxu1 }
 0x31a   :  { %v650_v55 = vmax.f32 %v646_v6, 0.0  ;;  %v642_v19 = vadd.f32 %v641_v58, %v499_v16  ;;  %v643_v57 = vpop.f32.mrb[3].mxu1 }
 0x31b   :  { %v651_v13 = vmax.f32 %v647_v10, 0.0  ;;  %v644_v45 = vadd.f32 %v643_v57, %v499_v16 }
 0x31c   :  { %654 = vst [vmem:[%s1382_s6] sm:$0xff] %v650_v55  ;;  %v648_v47 = vadd.f32 %v642_v19, %v789_v0 }
 0x31d   :  { %655 = vst [vmem:[%s1382_s6 + $0x8] sm:$0xff] %v651_v13  ;;  %v649_v1 = vadd.f32 %v644_v45, %v1385_v18 }
 0x31e   :  { %v652_v33 = vmax.f32 %v648_v47, 0.0 }
 0x31f   :  { %v653_v3 = vmax.f32 %v649_v1, 0.0 }
 0x320   :  { %656 = vst [vmem:[%s1382_s6 + $0x10] sm:$0xff] %v652_v33 }
 0x321   :  { %657 = vst [vmem:[%s1382_s6 + $0x18] sm:$0xff] %v653_v3 }

</bundles_post_ra>
